<compile_context>
chip_gen: v7x
topology: tpu7x:2x2x1
jax: 0.10.0
libtpu: 0.0.40
codegen_flags: <defaults>
</compile_context>

<pallas_src>
import jax
import jax.numpy as jnp
from jax import lax
from jax.experimental import pallas as pl
from jax.experimental.pallas import tpu as pltpu

_MASK_VALUE = -1e30  # large finite negative; exp() underflows to exactly 0.0


def _round_up(x, m):
    return (x + m - 1) // m * m


# -----------------------------------------------------------------------------
# Fused QKV projection: one (T, E) row tile  x  (E, 3*Hp) weights -> (T, 3*Hp).
# -----------------------------------------------------------------------------
def _qkv_proj_kernel(x_ref, w_ref, qkv_ref):
    x = x_ref[0]                                              # (T, E), input dtype
    qkv_ref[0] = jnp.dot(
        x, w_ref[...], preferred_element_type=jnp.float32).astype(qkv_ref.dtype)


# -----------------------------------------------------------------------------
# Flash-style causal attention over (q-tile, kv-tile) with online softmax.
# -----------------------------------------------------------------------------
def _flash_attn_kernel(q_ref, k_ref, v_ref, o_ref, m_sc, l_sc, acc_sc):
    qi = pl.program_id(1)
    ki = pl.program_id(2)
    nk = pl.num_programs(2)

    @pl.when(ki == 0)
    def _init():
        m_sc[...] = jnp.full(m_sc.shape, -jnp.inf, jnp.float32)
        l_sc[...] = jnp.zeros(l_sc.shape, jnp.float32)
        acc_sc[...] = jnp.zeros(acc_sc.shape, jnp.float32)

    def _accumulate(apply_causal_mask):
        q = q_ref[0]                                          # (T, Hp); scale in Wq
        k = k_ref[0]                                          # (T, Hp)
        # Contract over the head dim directly — no k.T materialization.
        s = lax.dot_general(q, k, (((1,), (1,)), ((), ())),
                            preferred_element_type=jnp.float32)   # (T, T)
        if apply_causal_mask:  # only the diagonal tile builds / applies the mask
            t = s.shape[0]
            row = lax.broadcasted_iota(jnp.int32, (t, t), 0)
            col = lax.broadcasted_iota(jnp.int32, (t, t), 1)
            s = jnp.where(col <= row, s, _MASK_VALUE)
        m_prev = m_sc[...]
        m_new = jnp.maximum(m_prev, jnp.max(s, axis=-1, keepdims=True))
        alpha = jnp.exp(m_prev - m_new)
        p = jnp.exp(s - m_new)
        l_sc[...] = alpha * l_sc[...] + jnp.sum(p, axis=-1, keepdims=True)
        acc_sc[...] = alpha * acc_sc[...] + jnp.dot(
            p.astype(v_ref.dtype), v_ref[0], preferred_element_type=jnp.float32)
        m_sc[...] = m_new

    @pl.when(ki < qi)      # below-diagonal tiles: no mask needed
    def _off_diag():
        _accumulate(apply_causal_mask=False)

    @pl.when(ki == qi)     # diagonal tile: local causal mask
    def _diag():
        _accumulate(apply_causal_mask=True)
    # (kv tiles with ki > qi are fully masked -> skipped entirely)

    # TODO(synk): nn.Dropout(0.2) on the attention probabilities is omitted
    # (eval-mode identity); add pltpu.prng_random_bits-based masking for training.

    @pl.when(ki == nk - 1)
    def _finalize():
        inv_l = pl.reciprocal(l_sc[...], approx=True)         # EUP slot, near-free
        o_ref[0] = (acc_sc[...] * inv_l).astype(o_ref.dtype)


# -----------------------------------------------------------------------------
# Wrapper
# -----------------------------------------------------------------------------
def self_attention(x, wq, wk, wv, *, tile=256):
    """Causal single-head attention.

    x: (B, S, E); wq/wk/wv: (H, E) PyTorch nn.Linear layout (y = x @ W.T).
    Returns (B, S, H), matching SelfAttention.forward in eval mode.
    """
    B, S, E = x.shape
    H = wq.shape[0]
    dtype = x.dtype

    # ---- layout plumbing in the wrapper (free relative to the kernels) ------
    Hp = _round_up(H, 128)                  # lane-dense head dim
    T = min(tile, _round_up(S, 8))          # q/kv tile size
    Sp = _round_up(S, T)                    # padded sequence length
    n_t = Sp // T

    scale = float(H) ** -0.5

    def _prep_weight(w, s=1.0):
        wt = (w * s).T.astype(dtype)                          # (E, H)
        return jnp.pad(wt, ((0, 0), (0, Hp - H)))             # (E, Hp)

    # Fold 1/sqrt(H) into the query projection; fuse Q|K|V into one weight slab.
    w_qkv = jnp.concatenate(
        [_prep_weight(wq, scale), _prep_weight(wk), _prep_weight(wv)], axis=1)

    x_p = jnp.pad(x, ((0, 0), (0, Sp - S), (0, 0)))

    # ---- fused QKV projection (hoisted, done once over all rows) ------------
    qkv = pl.pallas_call(
        _qkv_proj_kernel,
        out_shape=jax.ShapeDtypeStruct((B, Sp, 3 * Hp), dtype),
        grid_spec=pltpu.PrefetchScalarGridSpec(
            num_scalar_prefetch=0,
            grid=(B, n_t),
            in_specs=[
                pl.BlockSpec((1, T, E), lambda b, t: (b, t, 0)),
                pl.BlockSpec((E, 3 * Hp), lambda b, t: (0, 0)),
            ],
            out_specs=pl.BlockSpec((1, T, 3 * Hp), lambda b, t: (b, t, 0)),
        ),
        compiler_params=pltpu.CompilerParams(
            dimension_semantics=("parallel", "parallel"),
            vmem_limit_bytes=32 * 1024 * 1024,
        ),
    )(x_p, w_qkv)

    # ---- flash attention over (batch, q-tile, kv-tile) ----------------------
    # Q / K / V are three BlockSpec views (last-dim block 0 / 1 / 2) into the
    # fused slab.  The kv block index is clamped so causally-skipped tiles
    # re-use the previous block and spend no K/V DMA above the diagonal.
    out = pl.pallas_call(
        _flash_attn_kernel,
        out_shape=jax.ShapeDtypeStruct((B, Sp, Hp), dtype),
        grid_spec=pltpu.PrefetchScalarGridSpec(
            num_scalar_prefetch=0,
            grid=(B, n_t, n_t),
            in_specs=[
                pl.BlockSpec((1, T, Hp), lambda b, qi, ki: (b, qi, 0)),
                pl.BlockSpec((1, T, Hp),
                             lambda b, qi, ki: (b, jnp.minimum(ki, qi), 1)),
                pl.BlockSpec((1, T, Hp),
                             lambda b, qi, ki: (b, jnp.minimum(ki, qi), 2)),
            ],
            out_specs=pl.BlockSpec((1, T, Hp), lambda b, qi, ki: (b, qi, 0)),
            scratch_shapes=[
                pltpu.VMEM((T, 1), jnp.float32),    # running max  m
                pltpu.VMEM((T, 1), jnp.float32),    # running sum  l
                pltpu.VMEM((T, Hp), jnp.float32),   # output accumulator
            ],
        ),
        compiler_params=pltpu.CompilerParams(
            dimension_semantics=("parallel", "parallel", "arbitrary"),
            vmem_limit_bytes=32 * 1024 * 1024,
        ),
    )(qkv, qkv, qkv)

    # slice away the sequence / head padding
    return out[:, :S, :H]


# -----------------------------------------------------------------------------
# Pure-JAX reference matching the PyTorch forward (dropout in eval mode).
# -----------------------------------------------------------------------------
def _reference(x, wq, wk, wv):
    q = x @ wq.T
    k = x @ wk.T
    v = x @ wv.T
    att = (q @ jnp.swapaxes(k, -2, -1)) * (k.shape[-1] ** -0.5)
    S = x.shape[1]
    mask = jnp.tril(jnp.ones((S, S)))
    att = jnp.where(mask == 0, -jnp.inf, att)
    att = jax.nn.softmax(att, axis=-1)
    return att @ v


if __name__ == "__main__":
    # Module hyperparams (small, consistent with the forward):
    batch, seq_length, embed_size, head_size = 2, 8, 32, 16

    key = jax.random.PRNGKey(0)
    kx, kq, kk, kv_ = jax.random.split(key, 4)
    x = jax.random.normal(kx, (batch, seq_length, embed_size), dtype=jnp.float32)
    lim = 1.0 / (embed_size ** 0.5)
    wq = jax.random.uniform(kq, (head_size, embed_size), jnp.float32, -lim, lim)
    wk = jax.random.uniform(kk, (head_size, embed_size), jnp.float32, -lim, lim)
    wv = jax.random.uniform(kv_, (head_size, embed_size), jnp.float32, -lim, lim)

    out = jax.block_until_ready(self_attention(x, wq, wk, wv))
    ref = _reference(x, wq, wk, wv)

    assert out.shape == (batch, seq_length, head_size)
    # tolerance accounts for the EUP approx reciprocal in the softmax denominator
    assert jnp.allclose(out, ref, atol=2e-3, rtol=2e-3), (
        "mismatch vs reference: max abs err "
        f"{float(jnp.max(jnp.abs(out - ref))):.3e}")

    print("KERNEL_OK")
</pallas_src>

<mosaic_0001>
module attributes {stable_mosaic.version = 11 : i64} {
  func.func @_qkv_proj_kernel(%arg0: i32, %arg1: i32, %arg2: memref<1x8x32xf32, #tpu.memory_space<vmem>>, %arg3: memref<32x384xf32, #tpu.memory_space<vmem>>, %arg4: memref<1x8x384xf32, #tpu.memory_space<vmem>>) attributes {dimension_semantics = [#tpu.dimension_semantics<parallel>, #tpu.dimension_semantics<parallel>], iteration_bounds = array<i64: 2, 1>, scalar_prefetch = 0 : i64, scratch_operands = 0 : i64, tpu.core_type = #tpu.core_type<tc>, window_params = [{transform_indices = @transform_0, window_bounds = array<i64: 1, 8, 32>}, {pipeline_mode = #tpu.pipeline_mode<synchronous>, transform_indices = @transform_1, window_bounds = array<i64: 32, 384>}, {transform_indices = @transform_2, window_bounds = array<i64: 1, 8, 384>}]} {
    %c0 = arith.constant 0 : index
    %c0_0 = arith.constant 0 : index
    %c0_1 = arith.constant 0 : index
    %0 = vector.load %arg2[%c0, %c0_0, %c0_1] : memref<1x8x32xf32, #tpu.memory_space<vmem>>, vector<1x8x32xf32>
    %1 = vector.shape_cast %0 : vector<1x8x32xf32> to vector<8x32xf32>
    %c0_2 = arith.constant 0 : index
    %c0_3 = arith.constant 0 : index
    %2 = vector.load %arg3[%c0_2, %c0_3] : memref<32x384xf32, #tpu.memory_space<vmem>>, vector<32x384xf32>
    %cst = arith.constant dense<0.000000e+00> : vector<8x384xf32>
    %3 = tpu.matmul %1, %2, %cst {dimension_numbers = #tpu.dot_dimension_numbers<[1], [0], [0], [1], [0, 0, 1, 1], [], []>} : vector<8x32xf32>, vector<32x384xf32>, vector<8x384xf32> -> vector<8x384xf32>
    %c0_4 = arith.constant 0 : index
    %c0_5 = arith.constant 0 : index
    %c0_6 = arith.constant 0 : index
    %4 = vector.load %arg4[%c0_4, %c0_5, %c0_6] : memref<1x8x384xf32, #tpu.memory_space<vmem>>, vector<1x8x384xf32>
    %5 = vector.shape_cast %4 : vector<1x8x384xf32> to vector<8x384xf32>
    %6 = vector.shape_cast %3 : vector<8x384xf32> to vector<1x8x384xf32>
    tpu.vector_store %arg4[%c0_4, %c0_5, %c0_6], %6 {strides = array<i32>} : memref<1x8x384xf32, #tpu.memory_space<vmem>>, vector<1x8x384xf32>,
    return
  }
  func.func @transform_0(%arg0: i32, %arg1: i32) -> (i32, i32, i32) {
    %c0_i32 = arith.constant 0 : i32
    %c0_i32_0 = arith.constant 0 : i32
    return %arg0, %arg1, %c0_i32 : i32, i32, i32
  }
  func.func @transform_1(%arg0: i32, %arg1: i32) -> (i32, i32) {
    %c0_i32 = arith.constant 0 : i32
    %c0_i32_0 = arith.constant 0 : i32
    %c0_i32_1 = arith.constant 0 : i32
    return %c0_i32, %c0_i32_0 : i32, i32
  }
  func.func @transform_2(%arg0: i32, %arg1: i32) -> (i32, i32, i32) {
    %c0_i32 = arith.constant 0 : i32
    %c0_i32_0 = arith.constant 0 : i32
    return %arg0, %arg1, %c0_i32 : i32, i32, i32
  }
}

</mosaic_0001>

<bundles_post_ra>
// kernel: tpu_custom_call.1
= control target key start
LH: loop header
LB: loop body
LE: loop exit
PB: predicated region body
PF: predicated region fallthrough
CT: control target
= control target key end

     0   :  { %7 = vsyncpa [#allocation3], 0  ;;  %s973_s0 = inlined_call_operand.hbm [shape: f32[2,8,32], index: 0, kind: input, shape index: {}]   ;;  %s974_s1 = inlined_call_operand.hbm [shape: f32[32,384], index: 1, kind: input, shape index: {}]   ;;  %s975_s2 = inlined_call_operand.hbm [shape: f32[2,8,384], index: 2, kind: output, shape index: {}]  }
   0x1   :  { %9 = vsyncpa [#allocation3 + $0x1], 0 }
   0x2   :  { %10 = vsyncpa [#allocation6], 0 }
   0x3   :  { %11 = vsyncpa [#allocation4], 0 }
   0x4   :  { %13 = vsyncpa [#allocation4 + $0x1], 0  ;;  %s755_s9 = smov 0   ;;  %s757_s10 = smov 0  }
   0x5   :  { %s759_s11 = smov 0   ;;  %s761_s12 = smov 0  }
   0x6   :  { %s763_s13 = smov 0   ;;  %s765_s14 = smov 0  }
   0x7 LB: > { %s461_s15 = sadd.s32 4294967295, %s730_s14   ;;  %s462_s16 = sadd.s32 4294967294, %s730_s14   ;;  %s730_s14 = sphi %s765_s14, %s19_s14   ;;  %s726_s13 = sphi %s763_s13, %s999_s13   ;;  %s722_s12 = sphi %s761_s12, %s998_s12   ;;  %s718_s11 = sphi %s759_s11, %s997_s11   ;;  %s714_s10 = sphi %s757_s10, %s996_s10   ;;  %s710_s9 = sphi %s755_s9, %s995_s9  }
   0x8   : > { %p53_p0 = scmp.ne.s32.totalorder %s714_s10, %s710_s9  ;;  %p789_p1 = scmp.eq.s32.totalorder %s461_s15, 0 }
   0x9   : > { %p793_p2 = scmp.eq.s32.totalorder %s461_s15, 1  ;;  %p106_p3 = scmp.eq.s32.totalorder %s462_s16, 1 }
   0xa   : > { %s980_s17 = scalar_select %p789_p1, 1, 0 }
   0xb   : > { %s981_s18 = scalar_select %p793_p2, 1, 0 }
   0xc   : > { %p799_p4 = por %p789_p1, %p53_p0  ;;  %p463_p5 = scmp.ge.s32.totalorder %s730_s14, 1 }
   0xd   : > { %p804_p6 = por %p106_p3, %p53_p0  ;;  %p113_p7 = scmp.lt.s32.totalorder %s730_s14, 3 }
   0xe   : > { %s982_s19 = scalar_select %p799_p4, 1, 0 }
   0xf   : > { %s983_s20 = scalar_select %p804_p6, 1, 0 }
  0x10   : > { %p809_p8 = pnand %p463_p5, %p113_p7  ;;  %s732_s22 = smov [#allocation5]  }
  0x11   : > { %s125_s23 = sshll.u32 %s732_s22, 4  ;;  %s31_s25 = sadd.s32 1, %s726_s13  ;;  %s126_s23 = int_to_ptr.vmem [resolvable:$true] %s125_s23 }
  0x12   : > { %s984_s21 = scalar_select %p809_p8, 1, 0 }
  0x13   : > { %p516_p9 = pneg %p809_p8  ;;  %s586_s28 = scalar_lea.hbm %s974_s1, 1536 }
  0x14   : > { %p587_p12 = scmp.ne.s32.totalorder %s974_s1, %s586_s28  ;;  %p593_p5 = scmp.lt.u32.totalorder %s586_s28, %s974_s1 }
  0x15   : > { %p818_p11 = pnand %p516_p9, %p789_p1 }
  0x17   : > { %p588_p13 = pneg %p818_p11 }
  0x19   : > { %p589_p0 = pnand %p588_p13, %p587_p12 }
  0x1b   : > { %p590_p3 = pneg %p589_p0 }
  0x1d   : > { %p595_p7 = pnand %p593_p5, %p590_p3 }
  0x1f   : > { %598 = shalt.err (!%p595_p7)
}
  0x20   : > { %s599_s5 = scalar_lea.vmem %s126_s23, 1536  ;;  %p607_p1 = scmp.lt.s32.totalorder %s126_s23, %s126_s23 }
  0x21   : > { %p600_p9 = scmp.ne.s32.totalorder %s126_s23, %s599_s5  ;;  %p608_p4 = scmp.lt.s32.totalorder %s599_s5, %s599_s5 }
  0x23   : > { %p602_p10 = pnand %p600_p9, %p588_p13  ;;  %p609_p8 = por %p608_p4, %p607_p1 }
  0x25   : > { %p603_p6 = pneg %p602_p10 }
  0x27   : > { %p610_p2 = pnand %p609_p8, %p603_p6 }
  0x29   : > { %613 = shalt.err (!%p610_p2)
}
  0x2a   : > { %s733_s6 = smov 384   ;;  %s734_s7 = smov 24  }
  0x2b   : > { %519 = dma.hbm_to_vmem [thread:$0]  (!%p818_p11), %s974_s1, 1536, %s126_s23, [#allocation6], %s733_s6, %s733_s6, %s734_s7  }
  0x2c   : > { %p33_p1 = scmp.ge.s32.totalorder %s31_s25, 2  ;;  %s40_s16 = sadd.s32 1, %s718_s11 }
  0x2d   : > { %p47_p2 = scmp.ne.s32.totalorder %s718_s11, %s714_s10  ;;  %p48_p4 = scmp.eq.s32.totalorder %s730_s14, 0 }
  0x2e   : > { %s1001_s25 = smov (%p33_p1, %s31_s25), 0  ;;  %p987_p8 = scmp.ne.s32.totalorder %s981_s18, 0 }
  0x2f   : > { %p845_p6 = por %p48_p4, %p47_p2  ;;  %s35_s24 = ssub.s32 %s726_s13, %s1001_s25 }
  0x30   : > { %p851_p10 = por %p987_p8, %p47_p2  ;;  %p529_p12 = scmp.lt.s32.totalorder %s730_s14, 2 }
  0x31   : > { %p38_p11 = scmp.eq.s32.totalorder %s35_s24, 0  ;;  %s139_s23 = sand.u32 1, %s718_s11  }
  0x32   : > { %s466_s27 = sshll.u32 %s139_s23, 3  ;;  %s467_s29 = sshll.u32 %s726_s13, 7 }
  0x33   : > { %s860_s28 = scalar_select %p38_p11, %s718_s11, %s40_s16  }
  0x34   : > { %s866_s4 = scalar_lea.hbm %s973_s0, %s467_s29  ;;  %s143_s18 = scalar_lea.vmem [#allocation2], %s466_s27 }
  0x35   : > { %s151_s5 = sshll.u32 %s143_s18, 4  ;;  %p872_p13 = pnand %p529_p12, %p845_p6  ;;  %s868_s5 = int_to_ptr.vmem [resolvable:$true] %s151_s5 }
  0x36   : > { %s140_s7 = scalar_lea.sflag [#allocation3], %s139_s23  ;;  %s614_s8 = scalar_lea.hbm %s866_s4, 128 }
  0x37   : > { %p615_p0 = scmp.ne.s32.totalorder %s866_s4, %s614_s8  ;;  %p616_p3 = pneg %p872_p13 }
  0x38   : > { %s619_s24 = scalar_lea.hbm %s973_s0, 256  ;;  %p620_p9 = scmp.lt.u32.totalorder %s866_s4, %s973_s0 }
  0x39   : > { %p617_p5 = pnand %p616_p3, %p615_p0  ;;  %p621_p1 = scmp.lt.u32.totalorder %s619_s24, %s614_s8 }
  0x3a   : > { %p623_p4 = scmp.lt.u32.totalorder %s614_s8, %s866_s4 }
  0x3b   : > { %p618_p7 = pneg %p617_p5  ;;  %p622_p2 = por %p621_p1, %p620_p9 }
  0x3d   : > { %p624_p6 = por %p623_p4, %p622_p2 }
  0x3f   : > { %p625_p8 = pnand %p624_p6, %p618_p7 }
  0x41   : > { %628 = shalt.err (!%p625_p8)
}
  0x42   : > { %s629_s23 = scalar_lea.vmem %s868_s5, 128  ;;  %s735_s29 = smov [#allocation2]  }
  0x43   : > { %p630_p12 = scmp.ne.s32.totalorder %s868_s5, %s629_s23  ;;  %s634_s30 = sshll.u32 %s735_s29, 4  ;;  %s635_s30 = int_to_ptr.vmem [resolvable:$false] %s634_s30 }
  0x44   : > { %s636_s3 = scalar_lea.vmem %s635_s30, 256  ;;  %p637_p5 = scmp.lt.s32.totalorder %s868_s5, %s635_s30 }
  0x45   : > { %p632_p11 = pnand %p630_p12, %p616_p3  ;;  %p638_p9 = scmp.lt.s32.totalorder %s636_s3, %s629_s23 }
  0x47   : > { %p633_p0 = pneg %p632_p11  ;;  %p639_p1 = por %p638_p9, %p637_p5 }
  0x49   : > { %p640_p2 = pnand %p639_p1, %p633_p0 }
  0x4b   : > { %643 = shalt.err (!%p640_p2)
}
  0x4c   : > { %523 = dma.hbm_to_vmem [thread:$0]  (!%p872_p13), %s866_s4, 128, %s868_s5, %s140_s7  }
  0x4d   : > { %p990_p7 = scmp.ne.s32.totalorder %s984_s21, 0 }
  0x4e   : > { %s904_s18 = sand.u32 (!%p990_p7), 1, %s714_s10   ;;  %p991_p3 = scmp.ne.s32.totalorder (!%p990_p7), %s982_s19, 0 }
  0x4f   : > { %160 = sbr.rel (%p990_p7) target bundleno = 329 (0x149), region = 28  ;;  %s469_s8 = sshll.u32 (!%p990_p7), %s904_s18, 3 }
  0x50   : > { %s163_s15 = scalar_lea.sflag (!%p990_p7), [#allocation3], %s904_s18  ;;  %s908_s16 = scalar_lea.vmem (!%p990_p7), [#allocation2], %s469_s8 }
  0x56   : > { %697 = dma.done.wait (%p991_p3), %s163_s15, 128  }
  0x57   : > { %699 = vsyncadd (%p991_p3), %s163_s15, 4294967168  ;;  %p992_p13 = scmp.ne.s32.totalorder %s980_s17, 0 }
  0x59   : > { %701 = dma.done.wait (%p992_p13), [#allocation6], 1536  }
  0x5a   : > { %703 = vsyncadd (%p992_p13), [#allocation6], 4294965760  ;;  %v736_v0 = vmov 0.0|0.0   ;;  %v737_v1 = vmov 0.0   ;;  %vm738_vm0 = vmmov 0   ;;  %v193_v2 = vld [vmem:[#allocation5 + $0x8] sm:$0xff] }
  0x5b   : > { %500 = vmatprep.subr.bf16.mxu1 %v736_v0  ;;  %272 = vmatprep.mubr.f32.mxu0 %v737_v1  ;;  %v196_v3 = vld [vmem:[#allocation5 + $0x20] sm:$0xff]  ;;  %v195_v6 = vld [vmem:[#allocation5 + $0x18] sm:$0xff]  ;;  %v194_v7 = vld [vmem:[#allocation5 + $0x10] sm:$0xff]  ;;  %vm204_vm1 = vcmask 261120   ;;  %s506_s17 = smul.u32 24, %s904_s18  ;;  %s353_s24 = scalar_lea.sflag [#allocation4], %s904_s18 }
  0x5c   : > { %489 = vmatprep.mubr.msk.f32.mxu1 %vm738_vm0, %v737_v1  ;;  %v192_v4 = vld [vmem:[#allocation5] sm:$0xff]  ;;  %v492_v5 = vpack.c.bf16 %v196_v3, %v193_v2  ;;  %v197_v8 = vld [vmem:[#allocation5 + $0x28] sm:$0xff]  ;;  %v199_v11 = vld [vmem:[#allocation5 + $0x38] sm:$0xff]  ;;  %s507_s4 = smul.u32 384, %s722_s12  ;;  %s739_s12 = smov [#allocation7]  }
  0x5d   : > { %v494_v9 = vpack.c.bf16 %v195_v6, %v192_v4  ;;  %v501_v10 = vpack.c.bf16 %v197_v8, %v194_v7  ;;  %v202_v12 = vld [vmem:[#allocation5 + $0x50] sm:$0xff]  ;;  %v201_v15 = vld [vmem:[#allocation5 + $0x48] sm:$0xff]  ;;  %v200_v16 = vld [vmem:[#allocation5 + $0x40] sm:$0xff]  ;;  %s190_s19 = scalar_lea.vmem [#allocation7], %s506_s17  ;;  %s648_s27 = sshll.u32 %s739_s12, 4  ;;  %s649_s27 = int_to_ptr.vmem [resolvable:$false] %s648_s27 }
  0x5e   : > { %v198_v13 = vld [vmem:[#allocation5 + $0x30] sm:$0xff]  ;;  %493 = vmatprep.subr.bf16.mxu0 %v492_v5  ;;  %v496_v14 = vpack.c.bf16 %v202_v12, %v199_v11  ;;  %v203_v17 = vld [vmem:[#allocation5 + $0x58] sm:$0xff]  ;;  %s369_s21 = sshll.u32 %s190_s19, 4  ;;  %s926_s7 = scalar_lea.hbm %s975_s2, %s507_s4  ;;  %s921_s21 = int_to_ptr.vmem [resolvable:$true] %s369_s21 }
  0x5f   : > { %495 = vmatpush1.bf16.msra.mxu0 %v494_v9  ;;  %502 = vmatpush3.bf16.msra.mxu1 %v501_v10  ;;  %v498_v18 = vpack.c.bf16 %v201_v15, %v198_v13  ;;  %v504_v19 = vpack.c.bf16 %v203_v17, %v200_v16  ;;  %v191_v20 = vld [vmem:[%s908_s16] sm:$0xff]  ;;  %s644_s22 = scalar_lea.vmem %s921_s21, 384  ;;  %s650_s23 = scalar_lea.vmem %s649_s27, 768 }
  0x60   : > { %497 = vmatprep.subr.bf16.mxu0 %v496_v14  ;;  %503 = vmatprep.subr.bf16.mxu1 %v736_v0  ;;  %p645_p4 = scmp.ne.s32.totalorder %s921_s21, %s644_s22  ;;  %p651_p12 = scmp.lt.s32.totalorder %s921_s21, %s649_s27 }
  0x61   : > { %p652_p11 = scmp.lt.s32.totalorder %s650_s23, %s644_s22 }
  0x62   : > { %p646_p6 = pnand %p645_p4, %p851_p10 }
  0x63   : > { %499 = vmatpush1.bf16.msra.mxu0 %v498_v18  ;;  %505 = vmatpush3.bf16.msra.mxu1 %v504_v19  ;;  %p653_p0 = por %p652_p11, %p651_p12 }
  0x64   : > { %p647_p8 = pneg %p646_p6 }
  0x66   : > { %471 = vmatmul.mubr.msk.f32.vlgmr.msra.gmra.mrb[0].mxu0 %vm204_vm1, %v191_v20  ;;  %490 = vmatmul.mubr.msk.f32.vlgmr.msra.gmra.mrb[0].mxu1 %vm204_vm1, %v191_v20  ;;  %p654_p5 = pnand %p653_p0, %p647_p8 }
 0x139   : > { %v274_v21 = vpop.f32.mrb[0].mxu0  ;;  %v345_v22 = vpop.f32.mrb[0].mxu1 }
 0x13a   : > { %349 = vst [vmem:[%s190_s19] sm:$0xff] %v274_v21  ;;  %351 = vst [vmem:[%s190_s19 + $0x10] sm:$0xff] %v345_v22  ;;  %v276_v23 = vpop.f32.mrb[1].mxu0  ;;  %v491_v24 = vpop.f32.mrb[1].mxu1 }
 0x13b   : > { %350 = vst [vmem:[%s190_s19 + $0x8] sm:$0xff] %v276_v23 }
 0x13c   : > { %657 = shalt.err (!%p654_p5)
}
 0x13d   : > { %s658_s29 = scalar_lea.hbm %s926_s7, 384  ;;  %s662_s18 = scalar_lea.hbm %s975_s2, 768 }
 0x13e   : > { %p659_p9 = scmp.ne.s32.totalorder %s926_s7, %s658_s29  ;;  %p663_p7 = scmp.lt.u32.totalorder %s926_s7, %s975_s2 }
 0x13f   : > { %p664_p3 = scmp.lt.u32.totalorder %s662_s18, %s658_s29  ;;  %p666_p4 = scmp.lt.u32.totalorder %s658_s29, %s926_s7 }
 0x140   : > { %p660_p1 = pnand %p659_p9, %p851_p10 }
 0x141   : > { %p665_p13 = por %p664_p3, %p663_p7 }
 0x142   : > { %p661_p2 = pneg %p660_p1 }
 0x143   : > { %p667_p6 = por %p666_p4, %p665_p13 }
 0x145   : > { %p668_p8 = pnand %p667_p6, %p661_p2 }
 0x147   : > { %671 = shalt.err (!%p668_p8)
}
 0x148   : > { %514 = dma.vmem_to_hbm [thread:$0]  (%p851_p10), %s921_s21, 384, %s926_s7, %s353_s24  }
 0x149 PF: > { %s381_s16 = sand.u32 1, %s710_s9   ;;  %p993_p12 = scmp.ne.s32.totalorder %s983_s20, 0 }
 0x14a   : > { %p994_p11 = scmp.ge.s32.totalorder %s730_s14, 2  ;;  %s382_s17 = scalar_lea.sflag [#allocation4], %s381_s16 }
 0x14c   : > { %p525_p0 = pnand %p994_p11, %p993_p12 }
 0x14e   : > { %705 = dma.done.wait (!%p525_p0), %s382_s17, 384  }
 0x14f   : > { %707 = vsyncadd (!%p525_p0), %s382_s17, 4294966912  ;;  %s19_s14 = sadd.s32 1, %s730_s14   ;;  %s995_s9 = smov %s714_s10 }
 0x150   : > { %p16_p5 = scmp.ge.s32.totalorder %s19_s14, 4   ;;  %s996_s10 = smov %s718_s11 }
 0x151   : > { %s997_s11 = smov %s860_s28  ;;  %s998_s12 = smov %s726_s13 }
 0x152   : > { %s999_s13 = smov %s1001_s25  ;;  %18 = sbr.rel (!%p16_p5) target bundleno = 7 (0x7), region = 77 }
 0x159   :  { %387 = vsyncpa [#allocation3], 1 }
 0x15a   :  { %389 = vsyncpa [#allocation3 + $0x1], 1 }
 0x15b   :  { %390 = vsyncpa [#allocation6], 1 }
 0x15c   :  { %391 = vsyncpa [#allocation4], 1 }
 0x15d   :  { %393 = vsyncpa [#allocation4 + $0x1], 1 }

</bundles_post_ra>
